<compile_context>
chip_gen: v7x
topology: tpu7x:2x2x1
jax: 0.10.0
libtpu: 0.0.40
codegen_flags: <defaults>
</compile_context>

<pallas_src>
import jax
import jax.numpy as jnp
from jax.experimental import pallas as pl
from jax.experimental.pallas import tpu as pltpu

H1 = 64           # logical hidden 1 (PyTorch module)
H1P = 128         # hidden 1 zero-padded to a full lane width
H2 = 128          # hidden 2 (64 * 2)
LANE = 128
SUBLANE = 8


def _round_up(n, m):
    return ((n + m - 1) // m) * m


def _cdiv(a, b):
    return (a + b - 1) // b


def dqn_kernel(x_ref, w1_ref, b1_ref, w2_ref, b2_ref, w3_ref, b3_ref, o_ref):
    # Cast x to bf16 in-kernel (VPU, trivial for a (TILE_B, S) tile) so the
    # wrapper does not run a separate cast pass over x.
    x = x_ref[...].astype(jnp.bfloat16)
    # Layer 1: Linear(state_dim -> 64, zero-padded to 128) + ReLU.
    # bf16 x bf16 MXU matmul, f32 accumulation, f32 epilogue (v5e-safe).
    h1 = jnp.dot(x, w1_ref[...], preferred_element_type=jnp.float32)
    h1 = jnp.maximum(h1 + b1_ref[...], 0.0)
    # Layer 2: Linear(128 -> 128) + ReLU (lane-dense contraction, K=128).
    h2 = jnp.dot(h1.astype(jnp.bfloat16), w2_ref[...],
                 preferred_element_type=jnp.float32)
    h2 = jnp.maximum(h2 + b2_ref[...], 0.0)
    # Layer 3: Linear(128 -> action_dim), no activation.  Output block last
    # dim == full array dim (action_dim), so HBM writeback is only A f32/row.
    out = jnp.dot(h2.astype(jnp.bfloat16), w3_ref[...],
                  preferred_element_type=jnp.float32)
    o_ref[...] = (out + b3_ref[...]).astype(o_ref.dtype)


def prepare_dqn_params(params):
    """One-time weight prep (do after init / after each target-network sync).

    Zero-pads hidden-1 from 64 to 128 (w1 columns, b1, w2 rows) so every
    intermediate is lane-dense, and casts weights to bf16 for the MXU.
    Biases stay f32 (f32 epilogue in-kernel).
    """
    w1, b1, w2, b2, w3, b3 = params
    w1p = jnp.pad(w1, ((0, 0), (0, H1P - H1))).astype(jnp.bfloat16)
    b1p = jnp.pad(b1, ((0, 0), (0, H1P - H1)))
    w2p = jnp.pad(w2, ((0, H1P - H1), (0, 0))).astype(jnp.bfloat16)
    w3p = w3.astype(jnp.bfloat16)
    return (w1p, b1p, w2p, b2, w3p, b3)


def dqn_forward(x, prepared_params, *, max_tile_b=1024):
    """Forward pass of the DQN MLP.

    x: (B, state_dim) f32 -> (B, action_dim) f32.
    prepared_params: output of prepare_dqn_params().
    """
    w1, b1, w2, b2, w3, b3 = prepared_params
    B, S = x.shape
    A = w3.shape[1]

    # ---- Batch tiling ------------------------------------------------------
    # Big tiles amortize the ~0.35 us per-grid-step pipeline overhead; VMEM is
    # nowhere near the limit even at TILE_B=1024 (x 2*TILE_B*S*4 B, out
    # 2*TILE_B*A*4 B, ~50 KiB resident weights).
    TILE_B = min(max_tile_b, _round_up(B, SUBLANE))
    # v7x: guarantee >= 2 grid steps when B permits so the "parallel" batch
    # axis actually shards across both TensorCores (no-op on v5e/v6e).
    if B > SUBLANE:
        TILE_B = min(TILE_B, _round_up(_cdiv(B, 2), SUBLANE))
    # Bound padding waste: shrink the tile while round_up(B, TILE_B) would add
    # more than ~12.5% junk rows.
    B_pad = _round_up(B, TILE_B)
    while TILE_B > SUBLANE and (B_pad - B) * 8 > B:
        TILE_B = max(SUBLANE, _round_up(TILE_B // 2, SUBLANE))
        B_pad = _round_up(B, TILE_B)

    if B_pad != B:
        x = jnp.pad(x, ((0, B_pad - B), (0, 0)))

    grid = (B_pad // TILE_B,)

    def resident(shape):
        # Weights/biases: same block every grid step -> stay VMEM-resident.
        return pl.BlockSpec(shape, lambda i: (0, 0))

    flops = 2 * B_pad * (S * H1P + H1P * H2 + H2 * A)
    bytes_accessed = (
        B_pad * S * 4                            # streamed x (f32)
        + B_pad * A * 4                          # streamed output (f32)
        + (S * H1P + H1P * H2 + H2 * A) * 2      # bf16 weights (resident)
        + (H1P + H2 + A) * 4                     # f32 biases (resident)
    )

    out = pl.pallas_call(
        dqn_kernel,
        out_shape=jax.ShapeDtypeStruct((B_pad, A), jnp.float32),
        grid=grid,
        in_specs=[
            pl.BlockSpec((TILE_B, S), lambda i: (i, 0)),   # x tiles over batch
            resident((S, H1P)),
            resident((1, H1P)),
            resident((H1P, H2)),
            resident((1, H2)),
            resident((H2, A)),
            resident((1, A)),
        ],
        out_specs=pl.BlockSpec((TILE_B, A), lambda i: (i, 0)),
        compiler_params=pltpu.CompilerParams(
            dimension_semantics=("parallel",),   # shard batch tiles across TCs (v7x)
        ),
        cost_estimate=pl.CostEstimate(
            flops=flops, transcendentals=0, bytes_accessed=bytes_accessed
        ),
    )(x, w1, b1, w2, b2, w3, b3)

    if B_pad != B:
        out = out[:B]
    return out


def init_dqn_params(key, state_space_dim, action_space_dim):
    """Deterministic init mimicking torch.nn.Linear's uniform(-1/sqrt(fan_in), +)."""
    dims = [(state_space_dim, H1), (H1, H2), (H2, action_space_dim)]
    params = []
    for (fan_in, fan_out) in dims:
        key, kw, kb = jax.random.split(key, 3)
        bound = 1.0 / jnp.sqrt(float(fan_in))
        w = jax.random.uniform(kw, (fan_in, fan_out), jnp.float32, -bound, bound)
        # biases kept 2D (1, fan_out) for clean TPU lane layout / broadcasting
        b = jax.random.uniform(kb, (1, fan_out), jnp.float32, -bound, bound)
        params += [w, b]
    return tuple(params)


def dqn_reference(x, params):
    w1, b1, w2, b2, w3, b3 = params
    h1 = jnp.maximum(x @ w1 + b1, 0.0)
    h2 = jnp.maximum(h1 @ w2 + b2, 0.0)
    return h2 @ w3 + b3


if __name__ == "__main__":
    key = jax.random.PRNGKey(0)
    state_space_dim = 8
    action_space_dim = 4

    key, kx1, kx2 = jax.random.split(key, 3)
    params = init_dqn_params(key, state_space_dim, action_space_dim)
    prepared = prepare_dqn_params(params)   # one-time prep (hoisted out of forward)

    # Small action-selection-style batch.
    x1 = jax.random.normal(kx1, (8, state_space_dim), jnp.float32)
    out1 = jax.block_until_ready(dqn_forward(x1, prepared))
    ref1 = dqn_reference(x1, params)
    assert out1.shape == (8, action_space_dim)
    assert jnp.allclose(out1, ref1, atol=5e-2, rtol=5e-2), "mismatch (batch=8)"

    # Awkward batch size: exercises multi-tile grid + row padding/slicing.
    x2 = jax.random.normal(kx2, (50, state_space_dim), jnp.float32)
    out2 = jax.block_until_ready(dqn_forward(x2, prepared))
    ref2 = dqn_reference(x2, params)
    assert out2.shape == (50, action_space_dim)
    assert jnp.allclose(out2, ref2, atol=5e-2, rtol=5e-2), "mismatch (batch=50)"

    print("KERNEL_OK")
</pallas_src>

<mosaic_0001>
module attributes {stable_mosaic.version = 11 : i64} {
  func.func @dqn_kernel(%arg0: i32, %arg1: memref<8x8xf32, #tpu.memory_space<vmem>>, %arg2: memref<8x128xbf16, #tpu.memory_space<vmem>>, %arg3: memref<1x128xf32, #tpu.memory_space<vmem>>, %arg4: memref<128x128xbf16, #tpu.memory_space<vmem>>, %arg5: memref<1x128xf32, #tpu.memory_space<vmem>>, %arg6: memref<128x4xbf16, #tpu.memory_space<vmem>>, %arg7: memref<1x4xf32, #tpu.memory_space<vmem>>, %arg8: memref<8x4xf32, #tpu.memory_space<vmem>>) attributes {dimension_semantics = [#tpu.dimension_semantics<parallel>], iteration_bounds = array<i64: 1>, scalar_prefetch = 0 : i64, scratch_operands = 0 : i64, tpu.core_type = #tpu.core_type<tc>, window_params = [{transform_indices = @transform_0, window_bounds = array<i64: 8, 8>}, {pipeline_mode = #tpu.pipeline_mode<synchronous>, transform_indices = @transform_1, window_bounds = array<i64: 8, 128>}, {pipeline_mode = #tpu.pipeline_mode<synchronous>, transform_indices = @transform_2, window_bounds = array<i64: 1, 128>}, {pipeline_mode = #tpu.pipeline_mode<synchronous>, transform_indices = @transform_3, window_bounds = array<i64: 128, 128>}, {pipeline_mode = #tpu.pipeline_mode<synchronous>, transform_indices = @transform_4, window_bounds = array<i64: 1, 128>}, {pipeline_mode = #tpu.pipeline_mode<synchronous>, transform_indices = @transform_5, window_bounds = array<i64: 128, 4>}, {pipeline_mode = #tpu.pipeline_mode<synchronous>, transform_indices = @transform_6, window_bounds = array<i64: 1, 4>}, {transform_indices = @transform_7, window_bounds = array<i64: 8, 4>}]} {
    %c0 = arith.constant 0 : index
    %c0_0 = arith.constant 0 : index
    %0 = vector.load %arg1[%c0, %c0_0] : memref<8x8xf32, #tpu.memory_space<vmem>>, vector<8x8xf32>
    %1 = arith.truncf %0 : vector<8x8xf32> to vector<8x8xbf16>
    %c0_1 = arith.constant 0 : index
    %c0_2 = arith.constant 0 : index
    %2 = vector.load %arg2[%c0_1, %c0_2] : memref<8x128xbf16, #tpu.memory_space<vmem>>, vector<8x128xbf16>
    %cst = arith.constant dense<0.000000e+00> : vector<8x128xf32>
    %3 = tpu.matmul %1, %2, %cst {dimension_numbers = #tpu.dot_dimension_numbers<[1], [0], [0], [1], [0, 0, 1, 1], [], []>} : vector<8x8xbf16>, vector<8x128xbf16>, vector<8x128xf32> -> vector<8x128xf32>
    %c0_3 = arith.constant 0 : index
    %c0_4 = arith.constant 0 : index
    %4 = vector.load %arg3[%c0_3, %c0_4] : memref<1x128xf32, #tpu.memory_space<vmem>>, vector<1x128xf32>
    %5 = vector.broadcast %4 : vector<1x128xf32> to vector<8x128xf32>
    %6 = arith.addf %3, %5 : vector<8x128xf32>
    %cst_5 = arith.constant 0.000000e+00 : f32
    %7 = vector.broadcast %cst_5 : f32 to vector<8x128xf32>
    %8 = arith.maximumf %6, %7 : vector<8x128xf32>
    %9 = arith.truncf %8 : vector<8x128xf32> to vector<8x128xbf16>
    %c0_6 = arith.constant 0 : index
    %c0_7 = arith.constant 0 : index
    %10 = vector.load %arg4[%c0_6, %c0_7] : memref<128x128xbf16, #tpu.memory_space<vmem>>, vector<128x128xbf16>
    %cst_8 = arith.constant dense<0.000000e+00> : vector<8x128xf32>
    %11 = tpu.matmul %9, %10, %cst_8 {dimension_numbers = #tpu.dot_dimension_numbers<[1], [0], [0], [1], [0, 0, 1, 1], [], []>} : vector<8x128xbf16>, vector<128x128xbf16>, vector<8x128xf32> -> vector<8x128xf32>
    %c0_9 = arith.constant 0 : index
    %c0_10 = arith.constant 0 : index
    %12 = vector.load %arg5[%c0_9, %c0_10] : memref<1x128xf32, #tpu.memory_space<vmem>>, vector<1x128xf32>
    %13 = vector.broadcast %12 : vector<1x128xf32> to vector<8x128xf32>
    %14 = arith.addf %11, %13 : vector<8x128xf32>
    %cst_11 = arith.constant 0.000000e+00 : f32
    %15 = vector.broadcast %cst_11 : f32 to vector<8x128xf32>
    %16 = arith.maximumf %14, %15 : vector<8x128xf32>
    %17 = arith.truncf %16 : vector<8x128xf32> to vector<8x128xbf16>
    %c0_12 = arith.constant 0 : index
    %c0_13 = arith.constant 0 : index
    %18 = vector.load %arg6[%c0_12, %c0_13] : memref<128x4xbf16, #tpu.memory_space<vmem>>, vector<128x4xbf16>
    %cst_14 = arith.constant dense<0.000000e+00> : vector<8x4xf32>
    %19 = tpu.matmul %17, %18, %cst_14 {dimension_numbers = #tpu.dot_dimension_numbers<[1], [0], [0], [1], [0, 0, 1, 1], [], []>} : vector<8x128xbf16>, vector<128x4xbf16>, vector<8x4xf32> -> vector<8x4xf32>
    %c0_15 = arith.constant 0 : index
    %c0_16 = arith.constant 0 : index
    %20 = vector.load %arg7[%c0_15, %c0_16] : memref<1x4xf32, #tpu.memory_space<vmem>>, vector<1x4xf32>
    %21 = vector.broadcast %20 : vector<1x4xf32> to vector<8x4xf32>
    %22 = arith.addf %19, %21 : vector<8x4xf32>
    %c0_17 = arith.constant 0 : index
    %c0_18 = arith.constant 0 : index
    %23 = vector.load %arg8[%c0_17, %c0_18] : memref<8x4xf32, #tpu.memory_space<vmem>>, vector<8x4xf32>
    tpu.vector_store %arg8[%c0_17, %c0_18], %22 {strides = array<i32>} : memref<8x4xf32, #tpu.memory_space<vmem>>, vector<8x4xf32>,
    return
  }
  func.func @transform_0(%arg0: i32) -> (i32, i32) {
    %c0_i32 = arith.constant 0 : i32
    %c0_i32_0 = arith.constant 0 : i32
    return %arg0, %c0_i32 : i32, i32
  }
  func.func @transform_1(%arg0: i32) -> (i32, i32) {
    %c0_i32 = arith.constant 0 : i32
    %c0_i32_0 = arith.constant 0 : i32
    %c0_i32_1 = arith.constant 0 : i32
    return %c0_i32, %c0_i32_0 : i32, i32
  }
  func.func @transform_2(%arg0: i32) -> (i32, i32) {
    %c0_i32 = arith.constant 0 : i32
    %c0_i32_0 = arith.constant 0 : i32
    %c0_i32_1 = arith.constant 0 : i32
    return %c0_i32, %c0_i32_0 : i32, i32
  }
  func.func @transform_3(%arg0: i32) -> (i32, i32) {
    %c0_i32 = arith.constant 0 : i32
    %c0_i32_0 = arith.constant 0 : i32
    %c0_i32_1 = arith.constant 0 : i32
    return %c0_i32, %c0_i32_0 : i32, i32
  }
  func.func @transform_4(%arg0: i32) -> (i32, i32) {
    %c0_i32 = arith.constant 0 : i32
    %c0_i32_0 = arith.constant 0 : i32
    %c0_i32_1 = arith.constant 0 : i32
    return %c0_i32, %c0_i32_0 : i32, i32
  }
  func.func @transform_5(%arg0: i32) -> (i32, i32) {
    %c0_i32 = arith.constant 0 : i32
    %c0_i32_0 = arith.constant 0 : i32
    %c0_i32_1 = arith.constant 0 : i32
    return %c0_i32, %c0_i32_0 : i32, i32
  }
  func.func @transform_6(%arg0: i32) -> (i32, i32) {
    %c0_i32 = arith.constant 0 : i32
    %c0_i32_0 = arith.constant 0 : i32
    %c0_i32_1 = arith.constant 0 : i32
    return %c0_i32, %c0_i32_0 : i32, i32
  }
  func.func @transform_7(%arg0: i32) -> (i32, i32) {
    %c0_i32 = arith.constant 0 : i32
    %c0_i32_0 = arith.constant 0 : i32
    return %arg0, %c0_i32 : i32, i32
  }
}

</mosaic_0001>

<bundles_post_ra>
// kernel: tpu_custom_call.1
= control target key start
LH: loop header
LB: loop body
LE: loop exit
PB: predicated region body
PF: predicated region fallthrough
CT: control target
= control target key end

     0   :  { %vm41_vm0 = vcmask 1043456   ;;  %v421_v0 = vmov 0.0   ;;  %vm422_vm1 = vmmov 0   ;;  %vm37_vm2 = vcmask 64512   ;;  %s552_s1 = inlined_call_operand.vmem [shape: bf16[8,128], index: 1, kind: input, shape index: {}]   ;;  %s553_s0 = inlined_call_operand.vmem [shape: f32[8,8], index: 0, kind: input, shape index: {}]   ;;  %s554_s3 = inlined_call_operand.vmem [shape: bf16[128,128], index: 3, kind: input, shape index: {}]   ;;  %s555_s5 = inlined_call_operand.vmem [shape: bf16[128,4], index: 5, kind: input, shape index: {}]   ;;  %s556_s2 = inlined_call_operand.vmem [shape: f32[1,128], index: 2, kind: input, shape index: {}]   ;;  %s557_s4 = inlined_call_operand.vmem [shape: f32[1,128], index: 4, kind: input, shape index: {}]   ;;  %s558_s6 = inlined_call_operand.vmem [shape: f32[1,4], index: 6, kind: input, shape index: {}]   ;;  %s559_s7 = inlined_call_operand.vmem [shape: f32[8,4], index: 7, kind: output, shape index: {}]  }
   0x1   :  { %357 = vmatprep.subr.bf16.mxu0 %v421_v0  ;;  %v29_v1 = vld [vmem:[%s552_s1] sm:$0xf]  ;;  %359 = vmatprep.mubr.msk.bf16.mxu0 %vm422_vm1, %v421_v0  ;;  %v406_v6 = vld [vmem:[%s554_s3 + $0x8] sm:$0xff]   ;;  %v407_v7 = vld [vmem:[%s554_s3 + $0x10] sm:$0xff]   ;;  %vm311_vm3 = vcmask 31744  }
   0x2   :  { %v27_v2 = vld [vmem:[%s553_s0] sm:$0xff]  ;;  %v43_v3 = vsel %vm41_vm0, %v29_v1, 0  ;;  %363 = vmatprep.subr.bf16.mxu1 %v421_v0  ;;  %379 = vmatprep.mubr.msk.bf16.mxu1 %vm422_vm1, %v421_v0  ;;  %v408_v8 = vld [vmem:[%s554_s3 + $0x18] sm:$0xff]   ;;  %v410_v10 = vld [vmem:[%s554_s3 + $0x28] sm:$0xff]  }
   0x3   :  { %v28_v4 = vpack.c.bf16 %v27_v2, %v27_v2  ;;  %v405_v5 = vld [vmem:[%s554_s3] sm:$0xff]   ;;  %358 = vmatpush3.bf16.msra.mxu0 %v43_v3  ;;  %v411_v11 = vld [vmem:[%s554_s3 + $0x30] sm:$0xff]   ;;  %v412_v12 = vld [vmem:[%s554_s3 + $0x38] sm:$0xff]  }
   0x4   :  { %364 = vmatpush3.bf16.msra.mxu1 %v405_v5  ;;  %383 = vmatprep.subr.bf16.mxu0 %v421_v0  ;;  %v409_v9 = vld [vmem:[%s554_s3 + $0x20] sm:$0xff]   ;;  %v414_v14 = vld [vmem:[%s555_s5 + $0x8] sm:$0xff]   ;;  %v415_v15 = vld [vmem:[%s555_s5 + $0x10] sm:$0xff]  }
   0x5   :  { %365 = vmatprep.subr.bf16.mxu1 %v421_v0  ;;  %v413_v13 = vld [vmem:[%s555_s5] sm:$0xff]   ;;  %v416_v16 = vld [vmem:[%s555_s5 + $0x18] sm:$0xff]   ;;  %v418_v18 = vld [vmem:[%s555_s5 + $0x28] sm:$0xff]  }
   0x6   :  { %360 = vmatmul.mubr.msk.bf16.vlgmr.msra.gmra.mrb[0].mxu0 %vm37_vm2, %v28_v4  ;;  %v417_v17 = vld [vmem:[%s555_s5 + $0x20] sm:$0xff]   ;;  %v419_v27 = vld [vmem:[%s555_s5 + $0x30] sm:$0xff]   ;;  %v420_v28 = vld [vmem:[%s555_s5 + $0x38] sm:$0xff]  }
   0x7   :  { %399 = vmatprep.mubr.msk.bf16.mxu0 %vm422_vm1, %v421_v0  ;;  %384 = vmatpush3.bf16.msra.mxu0 %v413_v13  ;;  %v317_v19 = vld [vmem:[%s556_s2] ss:$0 sm:$0xff] }
   0x8   :  { %366 = vmatpush3.bf16.msra.mxu1 %v406_v6  ;;  %385 = vmatprep.subr.bf16.mxu0 %v421_v0  ;;  %v319_v29 = vld [vmem:[%s557_s4] ss:$0 sm:$0xff] }
   0x9   :  { %367 = vmatprep.subr.bf16.mxu1 %v421_v0  ;;  %v328_v37 = vld [vmem:[%s558_s6] ss:$0 sm:$0xff] }
   0xb   :  { %386 = vmatpush3.bf16.msra.mxu0 %v414_v14 }
   0xc   :  { %368 = vmatpush3.bf16.msra.mxu1 %v407_v7  ;;  %387 = vmatprep.subr.bf16.mxu0 %v421_v0 }
   0xd   :  { %369 = vmatprep.subr.bf16.mxu1 %v421_v0 }
   0xf   :  { %388 = vmatpush3.bf16.msra.mxu0 %v415_v15 }
  0x10   :  { %370 = vmatpush3.bf16.msra.mxu1 %v408_v8  ;;  %389 = vmatprep.subr.bf16.mxu0 %v421_v0 }
  0x11   :  { %371 = vmatprep.subr.bf16.mxu1 %v421_v0 }
  0x13   :  { %390 = vmatpush3.bf16.msra.mxu0 %v416_v16 }
  0x14   :  { %372 = vmatpush3.bf16.msra.mxu1 %v409_v9  ;;  %391 = vmatprep.subr.bf16.mxu0 %v421_v0 }
  0x15   :  { %373 = vmatprep.subr.bf16.mxu1 %v421_v0 }
  0x17   :  { %392 = vmatpush3.bf16.msra.mxu0 %v417_v17 }
  0x18   :  { %374 = vmatpush3.bf16.msra.mxu1 %v410_v10  ;;  %393 = vmatprep.subr.bf16.mxu0 %v421_v0 }
  0x19   :  { %375 = vmatprep.subr.bf16.mxu1 %v421_v0 }
  0x1b   :  { %394 = vmatpush3.bf16.msra.mxu0 %v418_v18 }
  0x1c   :  { %376 = vmatpush3.bf16.msra.mxu1 %v411_v11  ;;  %395 = vmatprep.subr.bf16.mxu0 %v421_v0 }
  0x1d   :  { %377 = vmatprep.subr.bf16.mxu1 %v421_v0 }
  0x1f   :  { %396 = vmatpush3.bf16.msra.mxu0 %v419_v27 }
  0x20   :  { %378 = vmatpush3.bf16.msra.mxu1 %v412_v12  ;;  %397 = vmatprep.subr.bf16.mxu0 %v421_v0 }
  0x23   :  { %398 = vmatpush3.bf16.msra.mxu0 %v420_v28 }
  0xd9   :  { %v79_v20 = vpop.f32.mrb[0].mxu0 }
  0xda   :  { %v80_v21 = vadd.f32 %v317_v19, %v79_v20  ;;  %v361_v22 = vpop.f32.mrb[1].mxu0 }
  0xdb   :  { %v82_v23 = vpop.f32.mrb[2].mxu0 }
  0xdc   :  { %v85_v24 = vmax.f32 %v80_v21, 0.0  ;;  %v362_v25 = vpop.f32.mrb[3].mxu0 }
  0xde   :  { %v86_v26 = vpack.c.bf16 %v85_v24, %v85_v24 }
  0xe0   :  { %380 = vmatmul.mubr.bf16.vlgmr.msra.gmra.mrb[0].mxu1 %v86_v26 }
 0x1b3   :  { %v192_v30 = vpop.f32.mrb[0].mxu1 }
 0x1b4   :  { %v193_v31 = vadd.f32 %v319_v29, %v192_v30  ;;  %v381_v32 = vpop.f32.mrb[1].mxu1 }
 0x1b5   :  { %v195_v33 = vpop.f32.mrb[2].mxu1 }
 0x1b6   :  { %v198_v34 = vmax.f32 %v193_v31, 0.0  ;;  %v382_v35 = vpop.f32.mrb[3].mxu1 }
 0x1b8   :  { %v199_v36 = vpack.c.bf16 %v198_v34, %v198_v34 }
 0x1ba   :  { %400 = vmatmul.mubr.bf16.vlgmr.msra.gmra.mrb[4].mxu0 %v199_v36 }
 0x28d   :  { %v305_v38 = vpop.f32.mrb[4].mxu0 }
 0x28e   :  { %v306_v39 = vadd.f32 %v328_v37, %v305_v38  ;;  %v401_v40 = vpop.f32.mrb[5].mxu0 }
 0x28f   :  { %v308_v41 = vpop.f32.mrb[6].mxu0 }
 0x290   :  { %312 = vst.msk [vmem:[%s559_s7] sm:$0xff] %vm311_vm3, %v306_v39  ;;  %v402_v42 = vpop.f32.mrb[7].mxu0 }

</bundles_post_ra>
